<compile_context>
chip_gen: v6e
topology: v6e:2x2x1
jax: 0.10.0
libtpu: 0.0.40
codegen_flags: <defaults>
</compile_context>

<pallas_src>
import math

import jax
import jax.numpy as jnp
from jax.experimental import pallas as pl
from jax.experimental.pallas import tpu as pltpu


def _make_lsigmoid_kernel(beta):
    beta = float(beta)

    def kernel(slope_ref, x_ref, o_ref):
        # slope_ref: (1, L), x_ref / o_ref: (R, L)
        x = x_ref[...]
        s = slope_ref[...]                       # (1, L) broadcasts over rows
        y = beta * jax.nn.sigmoid(x * s)
        o_ref[...] = y.astype(o_ref.dtype)

    return kernel


def _choose_fold(n_rows, f):
    """Fold consecutive rows into lanes so the last dim becomes a multiple of 128."""
    if f % 128 == 0:
        return 1
    cand = 128 // math.gcd(f, 128)
    if cand > 1 and n_rows % cand == 0:
        return cand
    return 1


def _choose_row_block(n_rows, n_lanes, itemsize, target_bytes=2 * 1024 * 1024):
    """Largest row block (multiple of 8, ~target_bytes) covering the row space."""
    if n_rows <= 8:
        return n_rows                              # equal-to-full-dim is allowed
    r = max(8, target_bytes // (n_lanes * itemsize))
    r = (r // 8) * 8
    r = min(r, ((n_rows + 7) // 8) * 8)            # don't exceed rounded-up rows
    return int(r)


def learnable_sigmoid_1d(x, slope, beta=1.0):
    """out = beta * sigmoid(slope * x); slope broadcasts over the last axis of x."""
    orig_shape = x.shape
    f = orig_shape[-1]
    assert slope.shape == (f,)

    n_rows = x.size // f
    itemsize = jnp.dtype(x.dtype).itemsize

    # Lane-folding for F < 128 (or any F not a multiple of 128).
    fold = _choose_fold(n_rows, f)
    nf = n_rows // fold
    lanes = fold * f

    x2 = x.reshape(nf, lanes)
    slope2 = jnp.tile(slope.astype(x.dtype), fold).reshape(1, lanes)

    r_blk = _choose_row_block(nf, lanes, itemsize)
    grid = (pl.cdiv(nf, r_blk),)

    total = x.size
    cost = pl.CostEstimate(
        flops=2 * total,                          # slope-mul + beta-mul
        transcendentals=total,                    # one exp per element
        bytes_accessed=2 * total * itemsize + lanes * itemsize,
    )

    out2 = pl.pallas_call(
        _make_lsigmoid_kernel(beta),
        out_shape=jax.ShapeDtypeStruct((nf, lanes), x.dtype),
        grid_spec=pltpu.PrefetchScalarGridSpec(
            num_scalar_prefetch=0,
            grid=grid,
            in_specs=[
                pl.BlockSpec((1, lanes), lambda i: (0, 0)),       # slope, resident
                pl.BlockSpec((r_blk, lanes), lambda i: (i, 0)),   # x rows
            ],
            out_specs=pl.BlockSpec((r_blk, lanes), lambda i: (i, 0)),
        ),
        compiler_params=pltpu.CompilerParams(
            dimension_semantics=("parallel",),
        ),
        cost_estimate=cost,
    )(slope2, x2)

    return out2.reshape(orig_shape)


if __name__ == "__main__":
    key = jax.random.PRNGKey(0)
    B, T, F = 2, 8, 32          # in_features = 32
    beta = 1.0

    x = jax.random.normal(key, (B, T, F), dtype=jnp.float32)

    # 1) Module default init: slope = ones (matches nn.Parameter(torch.ones(F))).
    slope = jnp.ones((F,), dtype=jnp.float32)
    out = learnable_sigmoid_1d(x, slope, beta=beta)
    out = jax.block_until_ready(out)
    ref = beta * jax.nn.sigmoid(slope[None, None, :] * x)
    assert out.shape == (B, T, F)
    assert jnp.allclose(out, ref, atol=1e-6, rtol=1e-6)

    # 2) Varying slope (exercises the lane-fold broadcast path).
    slope_v = jnp.linspace(0.5, 1.5, F, dtype=jnp.float32)
    out_v = jax.block_until_ready(learnable_sigmoid_1d(x, slope_v, beta=0.75))
    ref_v = 0.75 * jax.nn.sigmoid(slope_v[None, None, :] * x)
    assert jnp.allclose(out_v, ref_v, atol=1e-6, rtol=1e-6)

    print("KERNEL_OK")
</pallas_src>

<mosaic_0001>
module attributes {stable_mosaic.version = 11 : i64} {
  func.func @kernel(%arg0: i32, %arg1: memref<1x128xf32, #tpu.memory_space<vmem>>, %arg2: memref<4x128xf32, #tpu.memory_space<vmem>>, %arg3: memref<4x128xf32, #tpu.memory_space<vmem>>) attributes {dimension_semantics = [#tpu.dimension_semantics<parallel>], iteration_bounds = array<i64: 1>, scalar_prefetch = 0 : i64, scratch_operands = 0 : i64, tpu.core_type = #tpu.core_type<tc>, window_params = [{pipeline_mode = #tpu.pipeline_mode<synchronous>, transform_indices = @transform_0, window_bounds = array<i64: 1, 128>}, {transform_indices = @transform_1, window_bounds = array<i64: 4, 128>}, {transform_indices = @transform_2, window_bounds = array<i64: 4, 128>}]} {
    %c0 = arith.constant 0 : index
    %c0_0 = arith.constant 0 : index
    %0 = vector.load %arg2[%c0, %c0_0] : memref<4x128xf32, #tpu.memory_space<vmem>>, vector<4x128xf32>
    %c0_1 = arith.constant 0 : index
    %c0_2 = arith.constant 0 : index
    %1 = vector.load %arg1[%c0_1, %c0_2] : memref<1x128xf32, #tpu.memory_space<vmem>>, vector<1x128xf32>
    %2 = vector.broadcast %1 : vector<1x128xf32> to vector<4x128xf32>
    %3 = arith.mulf %0, %2 : vector<4x128xf32>
    %4 = arith.negf %3 : vector<4x128xf32>
    %5 = math.exp %4 : vector<4x128xf32>
    %cst = arith.constant 1.000000e+00 : f32
    %6 = vector.broadcast %cst : f32 to vector<4x128xf32>
    %7 = arith.addf %6, %5 : vector<4x128xf32>
    %8 = arith.divf %6, %7 : vector<4x128xf32>
    %cst_3 = arith.constant 1.000000e+00 : f32
    %9 = vector.broadcast %cst_3 : f32 to vector<4x128xf32>
    %10 = arith.mulf %9, %8 : vector<4x128xf32>
    %c0_4 = arith.constant 0 : index
    %c0_5 = arith.constant 0 : index
    %11 = vector.load %arg3[%c0_4, %c0_5] : memref<4x128xf32, #tpu.memory_space<vmem>>, vector<4x128xf32>
    tpu.vector_store %arg3[%c0_4, %c0_5], %10 {strides = array<i32>} : memref<4x128xf32, #tpu.memory_space<vmem>>, vector<4x128xf32>,
    return
  }
  func.func @transform_0(%arg0: i32) -> (i32, i32) {
    %c0_i32 = arith.constant 0 : i32
    %c0_i32_0 = arith.constant 0 : i32
    %c0_i32_1 = arith.constant 0 : i32
    return %c0_i32, %c0_i32_0 : i32, i32
  }
  func.func @transform_1(%arg0: i32) -> (i32, i32) {
    %c0_i32 = arith.constant 0 : i32
    %c0_i32_0 = arith.constant 0 : i32
    return %arg0, %c0_i32 : i32, i32
  }
  func.func @transform_2(%arg0: i32) -> (i32, i32) {
    %c0_i32 = arith.constant 0 : i32
    %c0_i32_0 = arith.constant 0 : i32
    return %arg0, %c0_i32 : i32, i32
  }
}

</mosaic_0001>

<bundles_post_ra>
// kernel: tpu_custom_call.1
= control target key start
LH: loop header
LB: loop body
LE: loop exit
PB: predicated region body
PF: predicated region fallthrough
CT: control target
= control target key end

     0   :  { %7 = vsyncpa [#allocation3], 0  ;;  %s170_s0 = inlined_call_operand.hbm [shape: f32[1,128], index: 0, kind: input, shape index: {}]   ;;  %s171_s1 = inlined_call_operand.hbm [shape: f32[4,128], index: 1, kind: input, shape index: {}]   ;;  %s172_s2 = inlined_call_operand.hbm [shape: f32[4,128], index: 2, kind: output, shape index: {}]  }
   0x1   :  { %8 = vsyncpa [#allocation6], 0 }
   0x2   :  { %9 = vsyncpa [#allocation4], 0  ;;  %s143_s9 = smov [#allocation2]   ;;  %s144_s11 = smov [#allocation5]  }
   0x3   :  { %s16_s10 = sshll.u32 %s143_s9, 4  ;;  %s26_s12 = sshll.u32 %s144_s11, 4  ;;  %s17_s10 = int_to_ptr.vmem [resolvable:$true] %s16_s10  ;;  %s27_s12 = int_to_ptr.vmem [resolvable:$true] %s26_s12 }
   0x4   :  { %s85_s13 = scalar_lea.vmem %s17_s10, 16  ;;  %s89_s14 = scalar_lea.vmem %s17_s10, 32 }
   0x5   :  { %p86_p0 = scmp.ne.s32.totalorder %s17_s10, %s85_s13  ;;  %p90_p1 = scmp.lt.s32.totalorder %s17_s10, %s17_s10 }
   0x6   :  { %p91_p2 = scmp.lt.s32.totalorder %s89_s14, %s85_s13 }
   0x8   :  { %p92_p3 = por %p91_p2, %p90_p1 }
   0xa   :  { %p93_p4 = pnand %p92_p3, %p86_p0 }
   0xc   :  { %96 = shalt.err (!%p93_p4)
}
   0xd   :  { %19 = dma.hbm_to_vmem [thread:$0]  %s170_s0, 16, %s17_s10, [#allocation3]  }
   0xe   :  { %s105_s17 = scalar_lea.vmem %s27_s12, 64  ;;  %p110_p6 = scmp.lt.s32.totalorder %s27_s12, %s27_s12 }
   0xf   :  { %p106_p5 = scmp.ne.s32.totalorder %s27_s12, %s105_s17  ;;  %p111_p7 = scmp.lt.s32.totalorder %s105_s17, %s105_s17 }
  0x11   :  { %p112_p8 = por %p111_p7, %p110_p6 }
  0x13   :  { %p113_p9 = pnand %p112_p8, %p106_p5 }
  0x15   :  { %116 = shalt.err (!%p113_p9)
}
  0x16   :  { %29 = dma.hbm_to_vmem [thread:$0]  %s171_s1, 64, %s27_s12, [#allocation6]  }
  0x17   :  { %137 = dma.done.wait [#allocation3], 16  }
  0x18   :  { %138 = vsyncadd [#allocation3], 4294967280 }
  0x19   :  { %139 = dma.done.wait [#allocation6], 64  }
  0x1a   :  { %140 = vsyncadd [#allocation6], 4294967232  ;;  %v36_v0 = vld [vmem:[#allocation5] sm:$0xf]  ;;  %v68_v1 = vld [vmem:[#allocation2] ss:$0 sm:$0xff] }
  0x1b   :  { %v44_v2 = vmul.f32 %v68_v1, %v36_v0  ;;  %s145_s0 = smov [#allocation7]  }
  0x1c   :  { %s58_s20 = sshll.u32 %s145_s0, 4  ;;  %s59_s20 = int_to_ptr.vmem [resolvable:$true] %s58_s20 }
  0x1d   :  { %v69_v3 = vmul.f32 -1.442695, %v44_v2  ;;  %s117_s21 = scalar_lea.vmem %s59_s20, 64  ;;  %p122_p11 = scmp.lt.s32.totalorder %s59_s20, %s59_s20 }
  0x1e   :  { %p118_p10 = scmp.ne.s32.totalorder %s59_s20, %s117_s21  ;;  %p123_p12 = scmp.lt.s32.totalorder %s117_s21, %s117_s21 }
  0x1f   :  { %73 = vpow2.f32 %v69_v3 }
  0x20   :  { %p124_p13 = por %p123_p12, %p122_p11 }
  0x22   :  { %p125_p0 = pnand %p124_p13, %p118_p10 }
  0x2c   :  { %v74_v4 = vpop.eup %73 }
  0x2d   :  { %v48_v5 = vadd.f32 1.0, %v74_v4 }
  0x2f   :  { %75 = vrcp.f32 %v48_v5 }
  0x3c   :  { %v76_v6 = vpop.eup %75 }
  0x3d   :  { %51 = vst [vmem:[#allocation7] sm:$0xf] %v76_v6 }
  0x3e   :  { %128 = shalt.err (!%p125_p0)
}
  0x3f   :  { %61 = dma.vmem_to_hbm [thread:$0]  %s59_s20, 64, %s172_s2, [#allocation4]  }
  0x40   :  { %141 = dma.done.wait [#allocation4], 64  }
  0x41   :  { %142 = vsyncadd [#allocation4], 4294967232 }
  0x42   :  { %65 = vsyncpa [#allocation3], 1 }
  0x43   :  { %66 = vsyncpa [#allocation6], 1 }
  0x44   :  { %67 = vsyncpa [#allocation4], 1 }

</bundles_post_ra>
